<compile_context>
chip_gen: v5e
topology: v5e:2x2
jax: 0.10.0
libtpu: 0.0.40
codegen_flags: <defaults>
</compile_context>

<pallas_src>
import functools
import math

import jax
import jax.numpy as jnp
from jax.experimental import pallas as pl
from jax.experimental.pallas import tpu as pltpu

LANE = 128        # lane (last-dim) width
SUBLANE = 8       # f32 sublane width
_MAX_BATCH_TILE = 256


def _round_up(x, m):
    return ((x + m - 1) // m) * m


# ----------------------------------------------------------------------------
# Pallas kernel: full DeterministicActor forward for one batch tile.
# Weights/biases arrive as (1, fan_in_p, fan_out_p) / (1, 1, fan_out_p) blocks
# selected by the prefetched subtask id; their index_maps are constant across
# the grid so they stay VMEM-resident while the state/output tiles stream.
# ----------------------------------------------------------------------------
def _actor_kernel(sid_ref, x_ref, w1_ref, b1_ref, w2_ref, b2_ref, w3_ref,
                  b3_ref, o_ref, xpad_ref, *, max_action, in_dim, precision):
    del sid_ref                                   # consumed by the index_maps
    wdt = w1_ref.dtype                            # bf16 (default) or f32
    in_p = xpad_ref.shape[-1]                     # lane-padded input width

    if in_dim == in_p:                            # already lane-aligned
        x = x_ref[...]
    else:
        # Zero the lane padding once; the scratch persists across grid steps,
        # real columns are overwritten every step, padded columns stay zero.
        @pl.when(pl.program_id(0) == 0)
        def _zero():
            xpad_ref[...] = jnp.zeros_like(xpad_ref)
        xpad_ref[:, :in_dim] = x_ref[...]
        x = xpad_ref[...]

    # NOTE: with f32 weights and precision=None the MXU runs its default
    # (bf16-pass) matmul with f32 accumulation; pass
    # precision=jax.lax.Precision.HIGHEST for true-f32 matmuls.
    h = jnp.dot(x.astype(wdt), w1_ref[0],
                preferred_element_type=jnp.float32, precision=precision)
    h = jnp.maximum(h + b1_ref[0], 0.0).astype(wdt)     # f32 bias/ReLU, fused cast
    h = jnp.dot(h, w2_ref[0],
                preferred_element_type=jnp.float32, precision=precision)
    h = jnp.maximum(h + b2_ref[0], 0.0).astype(wdt)
    a = jnp.dot(h, w3_ref[0],
                preferred_element_type=jnp.float32, precision=precision)
    a = a + b3_ref[0]
    o_ref[...] = (max_action * jnp.tanh(a)).astype(o_ref.dtype)   # lane-dense


# ----------------------------------------------------------------------------
# Wrapper: tile the batch (no host-side padding), dispatch the subtask via
# scalar prefetch, keep the per-subtask weight slab VMEM-resident.
# ----------------------------------------------------------------------------
@functools.partial(
    jax.jit,
    static_argnames=("max_action", "out_dim", "batch_tile", "precision"))
def skill_chaining_forward(stacked, state, subtask_id, *, max_action, out_dim,
                           batch_tile=None, precision=None):
    W1, B1, W2, B2, W3, B3 = (stacked["w1"], stacked["b1"], stacked["w2"],
                              stacked["b2"], stacked["w3"], stacked["b3"])
    _, in_p, hid_p = W1.shape
    out_p = W3.shape[2]
    B, in_dim = state.shape

    # Batch tiling: tiny batches use one full-extent block; otherwise pick a
    # sublane-multiple tile that yields >= 2 grid steps (v7x megacore) and
    # wastes at most 7 rows per tile.  Ragged last tiles are fine (bounded
    # DMAs; OOB rows are never written back).
    if batch_tile is not None:
        TB = batch_tile
    elif B <= SUBLANE:
        TB = B
    else:
        n_tiles = max(2, pl.cdiv(B, _MAX_BATCH_TILE))
        TB = min(_MAX_BATCH_TILE, _round_up(pl.cdiv(B, n_tiles), SUBLANE))
    grid_b = pl.cdiv(B, TB)

    x = state.astype(jnp.float32)                 # no-op if already f32
    sid = jnp.asarray([subtask_id], dtype=jnp.int32)

    def x_map(i, sid_ref):                        # moves with the batch tile
        return (i, 0)

    def w_map(i, sid_ref):                        # constant -> VMEM-resident
        return (sid_ref[0], 0, 0)

    wspec = lambda arr: pl.BlockSpec((1,) + arr.shape[1:], w_map)

    per_actor_bytes = sum(math.prod(a.shape[1:]) * a.dtype.itemsize
                          for a in (W1, B1, W2, B2, W3, B3))
    flops = 2 * B * (in_p * hid_p + hid_p * hid_p + hid_p * out_p)
    bytes_accessed = (x.size * x.dtype.itemsize + B * out_p * 4
                      + per_actor_bytes)
    cost = pl.CostEstimate(flops=flops, transcendentals=B * out_p,
                           bytes_accessed=bytes_accessed)

    # Scoped-VMEM budget: double-buffered weight/bias slabs + activation
    # tiles + scratch + slack (safe even on v7x's 64 MiB physical VMEM for
    # the configurations this actor realistically uses).
    tile_bytes = TB * (in_dim + in_p + 2 * out_p) * 4
    vmem_limit = int(min(64 << 20,
                         max(16 << 20,
                             2 * per_actor_bytes + 2 * tile_bytes + (4 << 20))))

    out_padded = pl.pallas_call(
        functools.partial(_actor_kernel, max_action=max_action, in_dim=in_dim,
                          precision=precision),
        grid_spec=pltpu.PrefetchScalarGridSpec(
            num_scalar_prefetch=1,
            grid=(grid_b,),
            in_specs=[
                pl.BlockSpec((TB, in_dim), x_map),
                wspec(W1), wspec(B1),
                wspec(W2), wspec(B2),
                wspec(W3), wspec(B3),
            ],
            out_specs=pl.BlockSpec((TB, out_p), x_map),
            scratch_shapes=[pltpu.VMEM((TB, in_p), jnp.float32)],
        ),
        out_shape=jax.ShapeDtypeStruct((B, out_p), jnp.float32),
        compiler_params=pltpu.CompilerParams(
            dimension_semantics=("parallel",),
            vmem_limit_bytes=vmem_limit),
        cost_estimate=cost,
    )(sid, x, W1, B1, W2, B2, W3, B3)

    return out_padded[:, :out_dim]


# ----------------------------------------------------------------------------
# Parameter init (mimics torch.nn.Linear: uniform +/- 1/sqrt(fan_in)).
# Weights stored as [fan_in, fan_out] (W.T of PyTorch) so kernel does x @ W.
# ----------------------------------------------------------------------------
def _init_linear(key, fan_in, fan_out):
    kw, kb = jax.random.split(key)
    bound = 1.0 / math.sqrt(fan_in)
    w = jax.random.uniform(kw, (fan_in, fan_out), jnp.float32, -bound, bound)
    b = jax.random.uniform(kb, (1, fan_out), jnp.float32, -bound, bound)
    return w, b


def init_deterministic_actor(key, in_dim, out_dim, hidden_dim):
    k1, k2, k3 = jax.random.split(key, 3)
    w1, b1 = _init_linear(k1, in_dim, hidden_dim)
    w2, b2 = _init_linear(k2, hidden_dim, hidden_dim)
    w3, b3 = _init_linear(k3, hidden_dim, out_dim)
    return {"w1": w1, "b1": b1, "w2": w2, "b2": b2, "w3": w3, "b3": b3}


# ----------------------------------------------------------------------------
# SkillChainingActor: stacked, lane-padded per-subtask parameter slabs.
# ----------------------------------------------------------------------------
class SkillChainingActorPallas:
    """Pallas-TPU SkillChainingActor.

    Per-subtask actors are stacked on a leading axis and selected in-kernel
    via scalar prefetch, so one compiled kernel serves every subtask.

    By default the weight *matrices are stored in bfloat16* (this is
    parameter quantization of the stored weights, not just mixed-precision
    compute).  Biases and all non-matmul math (bias add, ReLU, tanh, scale)
    stay float32 and matmuls accumulate in float32.  Pass
    param_dtype=jnp.float32 for exact storage, and precision=
    jax.lax.Precision.HIGHEST for true-f32 matmuls.
    """

    def __init__(self, in_dim, out_dim, hidden_dim=256, max_action=1.0,
                 middle_subtasks=None, last_subtask=None, key=None,
                 param_dtype=jnp.bfloat16, precision=None):
        self.in_dim, self.out_dim, self.hidden_dim = in_dim, out_dim, hidden_dim
        self.max_action = float(max_action)
        self.param_dtype = param_dtype
        self.precision = precision
        self.in_p = _round_up(in_dim, LANE)
        self.hid_p = _round_up(hidden_dim, LANE)
        self.out_p = _round_up(out_dim, LANE)

        subtasks = list(middle_subtasks) + [last_subtask]
        self._index = {s: i for i, s in enumerate(subtasks)}
        n = len(subtasks)

        # Stacked, zero-padded slabs (last-subtask slot stays zero until init).
        self._stacked = {
            "w1": jnp.zeros((n, self.in_p, self.hid_p), param_dtype),
            "b1": jnp.zeros((n, 1, self.hid_p), jnp.float32),
            "w2": jnp.zeros((n, self.hid_p, self.hid_p), param_dtype),
            "b2": jnp.zeros((n, 1, self.hid_p), jnp.float32),
            "w3": jnp.zeros((n, self.hid_p, self.out_p), param_dtype),
            "b3": jnp.zeros((n, 1, self.out_p), jnp.float32),
        }

        key = jax.random.PRNGKey(0) if key is None else key
        self.actors = {}
        for i, subtask in enumerate(middle_subtasks):
            params = init_deterministic_actor(jax.random.fold_in(key, i),
                                              in_dim, out_dim, hidden_dim)
            self.actors[subtask] = params
            self._set_slot(self._index[subtask], params)
        self.actors[last_subtask] = None          # filled later, like PyTorch

    def _set_slot(self, idx, p):
        st, pd = self._stacked, self.param_dtype
        h, o, i = self.hidden_dim, self.out_dim, self.in_dim
        st["w1"] = st["w1"].at[idx, :i, :h].set(p["w1"].astype(pd))
        st["b1"] = st["b1"].at[idx, :, :h].set(p["b1"].astype(jnp.float32))
        st["w2"] = st["w2"].at[idx, :h, :h].set(p["w2"].astype(pd))
        st["b2"] = st["b2"].at[idx, :, :h].set(p["b2"].astype(jnp.float32))
        st["w3"] = st["w3"].at[idx, :h, :o].set(p["w3"].astype(pd))
        st["b3"] = st["b3"].at[idx, :, :o].set(p["b3"].astype(jnp.float32))

    def __getitem__(self, key):
        return self.actors[key]

    def init_last_subtask_actor(self, last_subtask, actor_params):
        """Initialize with pre-trained local actor (deep-copied)."""
        assert self.actors[last_subtask] is None
        params = jax.tree_util.tree_map(jnp.array, actor_params)
        self.actors[last_subtask] = params
        self._set_slot(self._index[last_subtask], params)

    def forward(self, state, subtask):
        assert self.actors[subtask] is not None, f"'{subtask}' not initialized"
        state = jnp.asarray(state)
        squeeze = state.ndim == 1
        if squeeze:
            state = state[None, :]
        out = skill_chaining_forward(
            self._stacked, state, self._index[subtask],
            max_action=self.max_action, out_dim=self.out_dim,
            precision=self.precision)
        return out[0] if squeeze else out


# ----------------------------------------------------------------------------
# Pure-JAX reference.
# ----------------------------------------------------------------------------
def _ref_forward(params, state, max_action):
    h1 = jnp.maximum(state @ params["w1"] + params["b1"], 0.0)
    h2 = jnp.maximum(h1 @ params["w2"] + params["b2"], 0.0)
    return max_action * jnp.tanh(h2 @ params["w3"] + params["b3"])


if __name__ == "__main__":
    B, IN_DIM, OUT_DIM, HIDDEN = 2, 16, 4, 32
    middle_subtasks = ["grasp", "handover"]
    last_subtask = "release"

    root = jax.random.PRNGKey(0)
    state_small = jax.random.normal(jax.random.PRNGKey(1), (B, IN_DIM),
                                    jnp.float32)
    state_multi = jax.random.normal(jax.random.PRNGKey(2), (16, IN_DIM),
                                    jnp.float32)
    pretrained = init_deterministic_actor(jax.random.fold_in(root, 99),
                                          IN_DIM, OUT_DIM, HIDDEN)

    ok = True

    # Default path: bf16-stored weights (parameter quantization), f32 epilogue.
    actor = SkillChainingActorPallas(
        in_dim=IN_DIM, out_dim=OUT_DIM, hidden_dim=HIDDEN, max_action=1.0,
        middle_subtasks=middle_subtasks, last_subtask=last_subtask, key=root)
    actor.init_last_subtask_actor(last_subtask, pretrained)
    for subtask in middle_subtasks + [last_subtask]:
        out = jax.block_until_ready(actor.forward(state_small, subtask))
        ref = _ref_forward(actor[subtask], state_small, actor.max_action)
        ok = ok and out.shape == (B, OUT_DIM)
        ok = ok and bool(jnp.allclose(out, ref, atol=5e-2))

    # f32-stored weights + multi-tile batch (TB=8, grid=2 -> both v7x cores).
    # Tolerance covers the MXU's default (bf16-pass) f32 matmul precision.
    actor_f32 = SkillChainingActorPallas(
        in_dim=IN_DIM, out_dim=OUT_DIM, hidden_dim=HIDDEN, max_action=1.0,
        middle_subtasks=middle_subtasks, last_subtask=last_subtask, key=root,
        param_dtype=jnp.float32)
    actor_f32.init_last_subtask_actor(last_subtask, pretrained)
    for subtask in middle_subtasks + [last_subtask]:
        out = jax.block_until_ready(actor_f32.forward(state_multi, subtask))
        ref = _ref_forward(actor_f32[subtask], state_multi,
                           actor_f32.max_action)
        ok = ok and out.shape == (16, OUT_DIM)
        ok = ok and bool(jnp.allclose(out, ref, atol=2e-2))

    if ok:
        print("KERNEL_OK")
</pallas_src>

<mosaic_0001>
module attributes {stable_mosaic.version = 11 : i64} {
  func.func @_actor_kernel(%arg0: i32, %arg1: memref<1xi32, #tpu.memory_space<smem>>, %arg2: memref<2x16xf32, #tpu.memory_space<vmem>>, %arg3: memref<1x128x128xbf16, #tpu.memory_space<vmem>>, %arg4: memref<1x1x128xf32, #tpu.memory_space<vmem>>, %arg5: memref<1x128x128xbf16, #tpu.memory_space<vmem>>, %arg6: memref<1x1x128xf32, #tpu.memory_space<vmem>>, %arg7: memref<1x128x128xbf16, #tpu.memory_space<vmem>>, %arg8: memref<1x1x128xf32, #tpu.memory_space<vmem>>, %arg9: memref<2x128xf32, #tpu.memory_space<vmem>>, %arg10: memref<2x128xf32, #tpu.memory_space<vmem>>) attributes {dimension_semantics = [#tpu.dimension_semantics<parallel>], iteration_bounds = array<i64: 1>, scalar_prefetch = 1 : i64, scratch_operands = 1 : i64, tpu.core_type = #tpu.core_type<tc>, window_params = [{transform_indices = @transform_0, window_bounds = array<i64: 2, 16>}, {transform_indices = @transform_1, window_bounds = array<i64: 1, 128, 128>}, {transform_indices = @transform_2, window_bounds = array<i64: 1, 1, 128>}, {transform_indices = @transform_3, window_bounds = array<i64: 1, 128, 128>}, {transform_indices = @transform_4, window_bounds = array<i64: 1, 1, 128>}, {transform_indices = @transform_5, window_bounds = array<i64: 1, 128, 128>}, {transform_indices = @transform_6, window_bounds = array<i64: 1, 1, 128>}, {transform_indices = @transform_7, window_bounds = array<i64: 2, 128>}]} {
    %c0_i32 = arith.constant 0 : i32
    %0 = arith.cmpi eq, %arg0, %c0_i32 : i32
    %1 = arith.extui %0 : i1 to i32
    %c0_i32_0 = arith.constant 0 : i32
    %2 = arith.cmpi ne, %1, %c0_i32_0 : i32
    scf.if %2 {
      %cst_31 = arith.constant 0.000000e+00 : f32
      %38 = vector.broadcast %cst_31 : f32 to vector<2x128xf32>
      %c0_32 = arith.constant 0 : index
      %c0_33 = arith.constant 0 : index
      %39 = vector.load %arg10[%c0_32, %c0_33] : memref<2x128xf32, #tpu.memory_space<vmem>>, vector<2x128xf32>
      tpu.vector_store %arg10[%c0_32, %c0_33], %38 {strides = array<i32>} : memref<2x128xf32, #tpu.memory_space<vmem>>, vector<2x128xf32>,
    } else {
    }
    %c0 = arith.constant 0 : index
    %c0_1 = arith.constant 0 : index
    %3 = vector.load %arg2[%c0, %c0_1] : memref<2x16xf32, #tpu.memory_space<vmem>>, vector<2x16xf32>
    %c0_2 = arith.constant 0 : index
    %c0_3 = arith.constant 0 : index
    %4 = vector.load %arg10[%c0_2, %c0_3] : memref<2x128xf32, #tpu.memory_space<vmem>>, vector<2x16xf32>
    tpu.vector_store %arg10[%c0_2, %c0_3], %3 {strides = array<i32>} : memref<2x128xf32, #tpu.memory_space<vmem>>, vector<2x16xf32>,
    %c0_4 = arith.constant 0 : index
    %c0_5 = arith.constant 0 : index
    %5 = vector.load %arg10[%c0_4, %c0_5] : memref<2x128xf32, #tpu.memory_space<vmem>>, vector<2x128xf32>
    %6 = arith.truncf %5 : vector<2x128xf32> to vector<2x128xbf16>
    %c0_6 = arith.constant 0 : index
    %c0_7 = arith.constant 0 : index
    %c0_8 = arith.constant 0 : index
    %7 = vector.load %arg3[%c0_6, %c0_7, %c0_8] : memref<1x128x128xbf16, #tpu.memory_space<vmem>>, vector<1x128x128xbf16>
    %8 = vector.shape_cast %7 : vector<1x128x128xbf16> to vector<128x128xbf16>
    %cst = arith.constant dense<0.000000e+00> : vector<2x128xf32>
    %9 = tpu.matmul %6, %8, %cst {dimension_numbers = #tpu.dot_dimension_numbers<[1], [0], [0], [1], [0, 0, 1, 1], [], []>} : vector<2x128xbf16>, vector<128x128xbf16>, vector<2x128xf32> -> vector<2x128xf32>
    %c0_9 = arith.constant 0 : index
    %c0_10 = arith.constant 0 : index
    %c0_11 = arith.constant 0 : index
    %10 = vector.load %arg4[%c0_9, %c0_10, %c0_11] : memref<1x1x128xf32, #tpu.memory_space<vmem>>, vector<1x1x128xf32>
    %11 = vector.shape_cast %10 : vector<1x1x128xf32> to vector<1x128xf32>
    %12 = vector.broadcast %11 : vector<1x128xf32> to vector<2x128xf32>
    %13 = arith.addf %9, %12 : vector<2x128xf32>
    %cst_12 = arith.constant 0.000000e+00 : f32
    %14 = vector.broadcast %cst_12 : f32 to vector<2x128xf32>
    %15 = arith.maximumf %13, %14 : vector<2x128xf32>
    %16 = arith.truncf %15 : vector<2x128xf32> to vector<2x128xbf16>
    %c0_13 = arith.constant 0 : index
    %c0_14 = arith.constant 0 : index
    %c0_15 = arith.constant 0 : index
    %17 = vector.load %arg5[%c0_13, %c0_14, %c0_15] : memref<1x128x128xbf16, #tpu.memory_space<vmem>>, vector<1x128x128xbf16>
    %18 = vector.shape_cast %17 : vector<1x128x128xbf16> to vector<128x128xbf16>
    %cst_16 = arith.constant dense<0.000000e+00> : vector<2x128xf32>
    %19 = tpu.matmul %16, %18, %cst_16 {dimension_numbers = #tpu.dot_dimension_numbers<[1], [0], [0], [1], [0, 0, 1, 1], [], []>} : vector<2x128xbf16>, vector<128x128xbf16>, vector<2x128xf32> -> vector<2x128xf32>
    %c0_17 = arith.constant 0 : index
    %c0_18 = arith.constant 0 : index
    %c0_19 = arith.constant 0 : index
    %20 = vector.load %arg6[%c0_17, %c0_18, %c0_19] : memref<1x1x128xf32, #tpu.memory_space<vmem>>, vector<1x1x128xf32>
    %21 = vector.shape_cast %20 : vector<1x1x128xf32> to vector<1x128xf32>
    %22 = vector.broadcast %21 : vector<1x128xf32> to vector<2x128xf32>
    %23 = arith.addf %19, %22 : vector<2x128xf32>
    %cst_20 = arith.constant 0.000000e+00 : f32
    %24 = vector.broadcast %cst_20 : f32 to vector<2x128xf32>
    %25 = arith.maximumf %23, %24 : vector<2x128xf32>
    %26 = arith.truncf %25 : vector<2x128xf32> to vector<2x128xbf16>
    %c0_21 = arith.constant 0 : index
    %c0_22 = arith.constant 0 : index
    %c0_23 = arith.constant 0 : index
    %27 = vector.load %arg7[%c0_21, %c0_22, %c0_23] : memref<1x128x128xbf16, #tpu.memory_space<vmem>>, vector<1x128x128xbf16>
    %28 = vector.shape_cast %27 : vector<1x128x128xbf16> to vector<128x128xbf16>
    %cst_24 = arith.constant dense<0.000000e+00> : vector<2x128xf32>
    %29 = tpu.matmul %26, %28, %cst_24 {dimension_numbers = #tpu.dot_dimension_numbers<[1], [0], [0], [1], [0, 0, 1, 1], [], []>} : vector<2x128xbf16>, vector<128x128xbf16>, vector<2x128xf32> -> vector<2x128xf32>
    %c0_25 = arith.constant 0 : index
    %c0_26 = arith.constant 0 : index
    %c0_27 = arith.constant 0 : index
    %30 = vector.load %arg8[%c0_25, %c0_26, %c0_27] : memref<1x1x128xf32, #tpu.memory_space<vmem>>, vector<1x1x128xf32>
    %31 = vector.shape_cast %30 : vector<1x1x128xf32> to vector<1x128xf32>
    %32 = vector.broadcast %31 : vector<1x128xf32> to vector<2x128xf32>
    %33 = arith.addf %29, %32 : vector<2x128xf32>
    %34 = math.tanh %33 : vector<2x128xf32>
    %cst_28 = arith.constant 1.000000e+00 : f32
    %35 = vector.broadcast %cst_28 : f32 to vector<2x128xf32>
    %36 = arith.mulf %35, %34 : vector<2x128xf32>
    %c0_29 = arith.constant 0 : index
    %c0_30 = arith.constant 0 : index
    %37 = vector.load %arg9[%c0_29, %c0_30] : memref<2x128xf32, #tpu.memory_space<vmem>>, vector<2x128xf32>
    tpu.vector_store %arg9[%c0_29, %c0_30], %36 {strides = array<i32>} : memref<2x128xf32, #tpu.memory_space<vmem>>, vector<2x128xf32>,
    return
  }
  func.func @transform_0(%arg0: i32, %arg1: memref<1xi32, #tpu.memory_space<smem>>) -> (i32, i32) {
    %c0_i32 = arith.constant 0 : i32
    %c0_i32_0 = arith.constant 0 : i32
    return %arg0, %c0_i32 : i32, i32
  }
  func.func @transform_1(%arg0: i32, %arg1: memref<1xi32, #tpu.memory_space<smem>>) -> (i32, i32, i32) {
    %c0 = arith.constant 0 : index
    %0 = memref.load %arg1[%c0] : memref<1xi32, #tpu.memory_space<smem>>
    %c0_i32 = arith.constant 0 : i32
    %c0_i32_0 = arith.constant 0 : i32
    %c0_i32_1 = arith.constant 0 : i32
    return %0, %c0_i32, %c0_i32_0 : i32, i32, i32
  }
  func.func @transform_2(%arg0: i32, %arg1: memref<1xi32, #tpu.memory_space<smem>>) -> (i32, i32, i32) {
    %c0 = arith.constant 0 : index
    %0 = memref.load %arg1[%c0] : memref<1xi32, #tpu.memory_space<smem>>
    %c0_i32 = arith.constant 0 : i32
    %c0_i32_0 = arith.constant 0 : i32
    %c0_i32_1 = arith.constant 0 : i32
    return %0, %c0_i32, %c0_i32_0 : i32, i32, i32
  }
  func.func @transform_3(%arg0: i32, %arg1: memref<1xi32, #tpu.memory_space<smem>>) -> (i32, i32, i32) {
    %c0 = arith.constant 0 : index
    %0 = memref.load %arg1[%c0] : memref<1xi32, #tpu.memory_space<smem>>
    %c0_i32 = arith.constant 0 : i32
    %c0_i32_0 = arith.constant 0 : i32
    %c0_i32_1 = arith.constant 0 : i32
    return %0, %c0_i32, %c0_i32_0 : i32, i32, i32
  }
  func.func @transform_4(%arg0: i32, %arg1: memref<1xi32, #tpu.memory_space<smem>>) -> (i32, i32, i32) {
    %c0 = arith.constant 0 : index
    %0 = memref.load %arg1[%c0] : memref<1xi32, #tpu.memory_space<smem>>
    %c0_i32 = arith.constant 0 : i32
    %c0_i32_0 = arith.constant 0 : i32
    %c0_i32_1 = arith.constant 0 : i32
    return %0, %c0_i32, %c0_i32_0 : i32, i32, i32
  }
  func.func @transform_5(%arg0: i32, %arg1: memref<1xi32, #tpu.memory_space<smem>>) -> (i32, i32, i32) {
    %c0 = arith.constant 0 : index
    %0 = memref.load %arg1[%c0] : memref<1xi32, #tpu.memory_space<smem>>
    %c0_i32 = arith.constant 0 : i32
    %c0_i32_0 = arith.constant 0 : i32
    %c0_i32_1 = arith.constant 0 : i32
    return %0, %c0_i32, %c0_i32_0 : i32, i32, i32
  }
  func.func @transform_6(%arg0: i32, %arg1: memref<1xi32, #tpu.memory_space<smem>>) -> (i32, i32, i32) {
    %c0 = arith.constant 0 : index
    %0 = memref.load %arg1[%c0] : memref<1xi32, #tpu.memory_space<smem>>
    %c0_i32 = arith.constant 0 : i32
    %c0_i32_0 = arith.constant 0 : i32
    %c0_i32_1 = arith.constant 0 : i32
    return %0, %c0_i32, %c0_i32_0 : i32, i32, i32
  }
  func.func @transform_7(%arg0: i32, %arg1: memref<1xi32, #tpu.memory_space<smem>>) -> (i32, i32) {
    %c0_i32 = arith.constant 0 : i32
    %c0_i32_0 = arith.constant 0 : i32
    return %arg0, %c0_i32 : i32, i32
  }
}

</mosaic_0001>

<bundles_post_ra>
// kernel: skill_chaining_forward.1
= control target key start
LH: loop header
LB: loop body
LE: loop exit
PB: predicated region body
PF: predicated region fallthrough
CT: control target
= control target key end

     0   :  { %14 = vsyncpa [#allocation6], 0  ;;  %s862_s0 = inlined_call_operand.<no memory space> [shape: s32[1], index: 0, kind: input, shape index: {}]   ;;  %s863_s1 = inlined_call_operand.vmem [shape: f32[2,16], index: 1, kind: input, shape index: {}]   ;;  %s864_s2 = inlined_call_operand.hbm [shape: bf16[3,128,128], index: 2, kind: input, shape index: {}]   ;;  %s865_s3 = inlined_call_operand.hbm [shape: f32[3,1,128], index: 3, kind: input, shape index: {}]   ;;  %s866_s4 = inlined_call_operand.hbm [shape: bf16[3,128,128], index: 4, kind: input, shape index: {}]   ;;  %s867_s5 = inlined_call_operand.vmem [shape: f32[3,1,128], index: 5, kind: input, shape index: {}]   ;;  %s868_s6 = inlined_call_operand.hbm [shape: bf16[3,128,128], index: 6, kind: input, shape index: {}]   ;;  %s869_s7 = inlined_call_operand.hbm [shape: f32[3,1,128], index: 7, kind: input, shape index: {}]   ;;  %s870_s8 = inlined_call_operand.hbm [shape: f32[2,128], index: 8, kind: output, shape index: {}]  }
   0x1   :  { %15 = vsyncpa [#allocation9], 0 }
   0x2   :  { %16 = vsyncpa [#allocation12], 0  ;;  %s42_s9 = scalar_lea.hbm %s865_s3, %s862_s0 }
   0x3   :  { %17 = vsyncpa [#allocation7], 0  ;;  %s44_s10 = sshll.u32 %s42_s9, 4  ;;  %s722_s11 = smov [#allocation8]   ;;  %s45_s10 = int_to_ptr.hbm [resolvable:$true] %s44_s10 }
   0x4   :  { %s46_s12 = sshll.u32 %s722_s11, 4  ;;  %s570_s13 = sshra.s32 %s45_s10, 4  ;;  %s47_s12 = int_to_ptr.vmem [resolvable:$true] %s46_s12  ;;  %s571_s13 = int_to_ptr.hbm [resolvable:$true] %s570_s13 }
   0x5   :  { %s572_s14 = scalar_lea.hbm %s571_s13, 1  ;;  %s574_s17 = scalar_lea.hbm %s865_s3, 3 }
   0x6   :  { %p573_p0 = scmp.ne.s32.totalorder %s571_s13, %s572_s14  ;;  %p575_p1 = scmp.lt.s32.totalorder %s571_s13, %s865_s3 }
   0x7   :  { %p576_p2 = scmp.lt.s32.totalorder %s574_s17, %s572_s14 }
   0x9   :  { %p577_p3 = por %p576_p2, %p575_p1 }
   0xb   :  { %p578_p4 = pnand %p577_p3, %p573_p0 }
   0xd   :  { %581 = shalt.err (!%p578_p4)
}
   0xe   :  { %49 = dma.hbm_to_vmem [thread:$0]  %s45_s10, 16, %s47_s12, [#allocation9]  }
   0xf   :  { %s791_s22 = sshll.u32 %s862_s0, 6  ;;  %s723_s27 = smov [#allocation11]  }
  0x10   :  { %s81_s25 = scalar_lea.hbm %s868_s6, %s791_s22  ;;  %s84_s3 = sshll.u32 %s723_s27, 4  ;;  %s85_s3 = int_to_ptr.vmem [resolvable:$true] %s84_s3 }
  0x11   :  { %s82_s26 = sshll.u32 %s81_s25, 4  ;;  %s27_s30 = scalar_lea.hbm %s864_s2, %s791_s22  ;;  %s83_s26 = int_to_ptr.hbm [resolvable:$true] %s82_s26 }
  0x12   :  { %s594_s9 = sshra.s32 %s83_s26, 4  ;;  %s598_s13 = scalar_lea.hbm %s868_s6, 192  ;;  %s595_s9 = int_to_ptr.hbm [resolvable:$true] %s594_s9 }
  0x13   :  { %s596_s10 = scalar_lea.hbm %s595_s9, 64  ;;  %p599_p6 = scmp.lt.s32.totalorder %s595_s9, %s868_s6 }
  0x14   :  { %p597_p5 = scmp.ne.s32.totalorder %s595_s9, %s596_s10  ;;  %p600_p7 = scmp.lt.s32.totalorder %s598_s13, %s596_s10 }
  0x16   :  { %p601_p8 = por %p600_p7, %p599_p6 }
  0x18   :  { %p602_p9 = pnand %p601_p8, %p597_p5 }
  0x1a   :  { %605 = shalt.err (!%p602_p9)
}
  0x1b   :  { %s724_s16 = smov 64   ;;  %s725_s17 = smov 4  }
  0x1c   :  { %90 = dma.hbm_to_vmem [thread:$0]  %s83_s26, 1024, %s85_s3, [#allocation12], %s724_s16, %s724_s16, %s725_s17  }
  0x1d   :  { %s28_s18 = sshll.u32 %s27_s30, 4  ;;  %s726_s19 = smov [#allocation5]   ;;  %s29_s18 = int_to_ptr.hbm [resolvable:$true] %s28_s18 }
  0x1e   :  { %s30_s20 = sshll.u32 %s726_s19, 4  ;;  %s57_s6 = scalar_lea.hbm %s866_s4, %s791_s22  ;;  %s31_s20 = int_to_ptr.vmem [resolvable:$true] %s30_s20 }
  0x1f   :  { %s618_s24 = sshra.s32 %s29_s18, 4  ;;  %s622_s29 = scalar_lea.hbm %s864_s2, 192  ;;  %s619_s24 = int_to_ptr.hbm [resolvable:$true] %s618_s24 }
  0x20   :  { %s620_s25 = scalar_lea.hbm %s619_s24, 64  ;;  %p623_p11 = scmp.lt.s32.totalorder %s619_s24, %s864_s2 }
  0x21   :  { %p621_p10 = scmp.ne.s32.totalorder %s619_s24, %s620_s25  ;;  %p624_p12 = scmp.lt.s32.totalorder %s622_s29, %s620_s25 }
  0x23   :  { %p625_p13 = por %p624_p12, %p623_p11 }
  0x25   :  { %p626_p0 = pnand %p625_p13, %p621_p10 }
  0x27   :  { %629 = shalt.err (!%p626_p0)
}
  0x28   :  { %36 = dma.hbm_to_vmem [thread:$0]  %s29_s18, 1024, %s31_s20, [#allocation6], %s724_s16, %s724_s16, %s725_s17  }
  0x29   :  { %s58_s22 = sshll.u32 %s57_s6, 4  ;;  %s727_s26 = smov [#allocation10]   ;;  %s59_s22 = int_to_ptr.hbm [resolvable:$true] %s58_s22 }
  0x2a   :  { %s60_s3 = sshll.u32 %s727_s26, 4  ;;  %s96_s2 = scalar_lea.hbm %s869_s7, %s862_s0  ;;  %s61_s3 = int_to_ptr.vmem [resolvable:$true] %s60_s3 }
  0x2b   :  { %s642_s14 = sshra.s32 %s59_s22, 4  ;;  %s646_s18 = scalar_lea.hbm %s866_s4, 192  ;;  %s643_s14 = int_to_ptr.hbm [resolvable:$true] %s642_s14 }
  0x2c   :  { %s644_s15 = scalar_lea.hbm %s643_s14, 64  ;;  %p647_p2 = scmp.lt.s32.totalorder %s643_s14, %s866_s4 }
  0x2d   :  { %p645_p1 = scmp.ne.s32.totalorder %s643_s14, %s644_s15  ;;  %p648_p3 = scmp.lt.s32.totalorder %s646_s18, %s644_s15 }
  0x2f   :  { %p649_p4 = por %p648_p3, %p647_p2 }
  0x31   :  { %p650_p5 = pnand %p649_p4, %p645_p1 }
  0x33   :  { %653 = shalt.err (!%p650_p5)
}
  0x34   :  { %66 = dma.hbm_to_vmem [thread:$0]  %s59_s22, 1024, %s61_s3, [#allocation9], %s724_s16, %s724_s16, %s725_s17  }
  0x35   :  { %s98_s6 = sshll.u32 %s96_s2, 4  ;;  %s728_s24 = smov [#allocation13]   ;;  %s99_s6 = int_to_ptr.hbm [resolvable:$true] %s98_s6 }
  0x36   :  { %s100_s25 = sshll.u32 %s728_s24, 4  ;;  %s666_s27 = sshra.s32 %s99_s6, 4  ;;  %s101_s25 = int_to_ptr.vmem [resolvable:$true] %s100_s25  ;;  %s667_s27 = int_to_ptr.hbm [resolvable:$true] %s666_s27 }
  0x37   :  { %s668_s28 = scalar_lea.hbm %s667_s27, 1  ;;  %s670_s4 = scalar_lea.hbm %s869_s7, 3 }
  0x38   :  { %p669_p6 = scmp.ne.s32.totalorder %s667_s27, %s668_s28  ;;  %p671_p7 = scmp.lt.s32.totalorder %s667_s27, %s869_s7 }
  0x39   :  { %p672_p8 = scmp.lt.s32.totalorder %s670_s4, %s668_s28 }
  0x3b   :  { %p673_p9 = por %p672_p8, %p671_p7 }
  0x3d   :  { %p674_p10 = pnand %p673_p9, %p669_p6 }
  0x3f   :  { %677 = shalt.err (!%p674_p10)
}
  0x40   :  { %103 = dma.hbm_to_vmem [thread:$0]  %s99_s6, 16, %s101_s25, [#allocation12]  }
  0x41   :  { %714 = dma.done.wait [#allocation6], 1024  }
  0x42   :  { %715 = vsyncadd [#allocation6], 4294966272 }
  0x43   :  { %716 = dma.done.wait [#allocation9], 1040  }
  0x44   :  { %717 = vsyncadd [#allocation9], 4294966256 }
  0x45   :  { %718 = dma.done.wait [#allocation12], 1040  }
  0x46   :  { %719 = vsyncadd [#allocation12], 4294966256  ;;  %v729_v0 = vmov 0.0   ;;  %v539_v1 = vld [vmem:[#allocation5 + $0x38] sm:$0xff]  ;;  %vm144_vm0 = vcmask 123904   ;;  %v538_v2 = vld [vmem:[#allocation5 + $0x30] sm:$0xff] }
  0x47   :  { %142 = vst [vmem:[#allocation2] sm:$0x3] %v729_v0  ;;  %216 = vmatpush.bf16.msra.mxu0 %v539_v1  ;;  %v143_v3 = vld [vmem:[%s863_s1] sm:$0x3]  ;;  %v546_v5 = vld [vmem:[#allocation10 + $0x30] sm:$0xff]  ;;  %v537_v6 = vld [vmem:[#allocation5 + $0x28] sm:$0xff] }
  0x48   :  { %145 = vst.msk [vmem:[#allocation2] sm:$0x3] %vm144_vm0, %v143_v3  ;;  %v547_v4 = vld [vmem:[#allocation10 + $0x38] sm:$0xff]  ;;  %v545_v7 = vld [vmem:[#allocation10 + $0x28] sm:$0xff]  ;;  %v544_v9 = vld [vmem:[#allocation10 + $0x20] sm:$0xff]  ;;  %p132_p11 = scmp.lt.s32.totalorder %s862_s0, 2 }
  0x49   :  { %299 = vmatpush.bf16.msra.mxu1 %v547_v4  ;;  %v536_v8 = vld [vmem:[#allocation5 + $0x20] sm:$0xff]  ;;  %v535_v10 = vld [vmem:[#allocation5 + $0x18] sm:$0xff]  ;;  %v534_v12 = vld [vmem:[#allocation5 + $0x10] sm:$0xff]  ;;  %s404_s14 = sshll.u32 %s870_s8, 4  ;;  %s405_s14 = int_to_ptr.hbm [resolvable:$true] %s404_s14 }
  0x4a   :  { %v543_v11 = vld [vmem:[#allocation10 + $0x18] sm:$0xff]  ;;  %v542_v13 = vld [vmem:[#allocation10 + $0x10] sm:$0xff]  ;;  %v533_v14 = vld [vmem:[#allocation5 + $0x8] sm:$0xff]  ;;  %s872_s0 = smov (!%p132_p11, %s862_s0), 2 }
  0x4b   :  { %217 = vmatpush.bf16.msra.mxu0 %v538_v2  ;;  %v532_v15 = vld [vmem:[#allocation5] sm:$0xff]  ;;  %s134_s12 = scalar_lea.vmem %s867_s5, %s872_s0  ;;  %v541_v18 = vld [vmem:[#allocation10 + $0x8] sm:$0xff]  ;;  %v554_v21 = vld [vmem:[#allocation11 + $0x30] sm:$0xff]  ;;  %s730_s0 = smov [#allocation14]  }
  0x4c   :  { %v540_v19 = vld [vmem:[#allocation10] sm:$0xff]  ;;  %v555_v20 = vld [vmem:[#allocation11 + $0x38] sm:$0xff]  ;;  %v553_v22 = vld [vmem:[#allocation11 + $0x28] sm:$0xff]  ;;  %s402_s5 = sshll.u32 %s730_s0, 4  ;;  %s403_s5 = int_to_ptr.vmem [resolvable:$true] %s402_s5 }
  0x4d   :  { %300 = vmatpush.bf16.msra.mxu1 %v546_v5  ;;  %382 = vmatpush.bf16.msra.mxu2 %v555_v20  ;;  %v552_v23 = vld [vmem:[#allocation11 + $0x20] sm:$0xff]  ;;  %v551_v24 = vld [vmem:[#allocation11 + $0x18] sm:$0xff]  ;;  %v550_v25 = vld [vmem:[#allocation11 + $0x10] sm:$0xff] }
  0x4e   :  { %v565_v26 = vld [vmem:[#allocation8] ss:$0 sm:$0xff]  ;;  %v549_v32 = vld [vmem:[#allocation11 + $0x8] sm:$0xff]  ;;  %v548_v33 = vld [vmem:[#allocation11] sm:$0xff] }
  0x4f   :  { %218 = vmatpush.bf16.msra.mxu0 %v537_v6  ;;  %v146_v16 = vld [vmem:[#allocation2] sm:$0x3]  ;;  %v567_v40 = vld [vmem:[#allocation13] ss:$0 sm:$0xff] }
  0x50   :  { %v147_v17 = vpack.c.bf16 %v146_v16, %v146_v16  ;;  %v566_v34 = vld [vmem:[%s134_s12] ss:$0 sm:$0xff] }
  0x51   :  { %301 = vmatpush.bf16.msra.mxu1 %v545_v7  ;;  %383 = vmatpush.bf16.msra.mxu2 %v554_v21 }
  0x53   :  { %219 = vmatpush.bf16.msra.mxu0 %v536_v8 }
  0x55   :  { %302 = vmatpush.bf16.msra.mxu1 %v544_v9  ;;  %384 = vmatpush.bf16.msra.mxu2 %v553_v22 }
  0x57   :  { %220 = vmatpush.bf16.msra.mxu0 %v535_v10 }
  0x59   :  { %303 = vmatpush.bf16.msra.mxu1 %v543_v11  ;;  %385 = vmatpush.bf16.msra.mxu2 %v552_v23 }
  0x5b   :  { %221 = vmatpush.bf16.msra.mxu0 %v534_v12 }
  0x5d   :  { %304 = vmatpush.bf16.msra.mxu1 %v542_v13  ;;  %386 = vmatpush.bf16.msra.mxu2 %v551_v24 }
  0x5f   :  { %222 = vmatpush.bf16.msra.mxu0 %v533_v14 }
  0x61   :  { %305 = vmatpush.bf16.msra.mxu1 %v541_v18  ;;  %387 = vmatpush.bf16.msra.mxu2 %v550_v25 }
  0x63   :  { %223 = vmatpush.bf16.msra.mxu0 %v532_v15 }
  0x65   :  { %306 = vmatpush.bf16.msra.mxu1 %v540_v19  ;;  %388 = vmatpush.bf16.msra.mxu2 %v549_v32 }
  0x66   :  { %224 = vmatmul.bf16.vlgmr.msra.gmra.mxu0 %v147_v17 }
  0x69   :  { %389 = vmatpush.bf16.msra.mxu2 %v548_v33 }
  0xe3   :  { %v225_v27 = vpop.f32.mrf.mxu0 }
  0xe4   :  { %v226_v28 = vadd.f32 %v565_v26, %v225_v27 }
  0xe6   :  { %v229_v29 = vmax.f32 %v226_v28, 0.0 }
  0xe8   :  { %v230_v30 = vpack.c.bf16 %v229_v29, %v229_v29 }
  0xea   :  { %307 = vmatmul.bf16.vlgmr.msra.gmra.mxu1 %v230_v30 }
  0xeb   :  { %v227_v31 = vpop.f32.mrf.mxu0 }
 0x167   :  { %v308_v35 = vpop.f32.mrf.mxu1 }
 0x168   :  { %v309_v36 = vadd.f32 %v566_v34, %v308_v35 }
 0x16a   :  { %v312_v37 = vmax.f32 %v309_v36, 0.0 }
 0x16c   :  { %v313_v38 = vpack.c.bf16 %v312_v37, %v312_v37 }
 0x16e   :  { %390 = vmatmul.bf16.vlgmr.msra.gmra.mxu2 %v313_v38 }
 0x16f   :  { %v310_v39 = vpop.f32.mrf.mxu1 }
 0x1f1   :  { %v391_v41 = vpop.f32.mrf.mxu2 }
 0x1f2   :  { %v392_v42 = vadd.f32 %v567_v40, %v391_v41 }
 0x1f4   :  { %568 = vtanh.f32 %v392_v42 }
 0x1f9   :  { %v393_v43 = vpop.f32.mrf.mxu2 }
 0x1fa   :  { %v569_v44 = vpop.eup %568 }
 0x1fb   :  { %396 = vst [vmem:[#allocation14] sm:$0x3] %v569_v44 }
 0x1fc   :  { %407 = dma.vmem_to_hbm [thread:$0]  %s403_s5, 32, %s405_s14, [#allocation7]  }
 0x1fd   :  { %720 = dma.done.wait [#allocation7], 32  }
 0x1fe   :  { %721 = vsyncadd [#allocation7], 4294967264 }
 0x1ff   :  { %412 = vsyncpa [#allocation6], 1 }
 0x200   :  { %413 = vsyncpa [#allocation9], 1 }
 0x201   :  { %414 = vsyncpa [#allocation12], 1 }
 0x202   :  { %415 = vsyncpa [#allocation7], 1 }

</bundles_post_ra>
